<compile_context>
chip_gen: v6e
topology: v6e:2x2x1
jax: 0.10.0
libtpu: 0.0.40
codegen_flags: <defaults>
</compile_context>

<pallas_src>
import functools

import jax
import jax.numpy as jnp
from jax import lax
from jax.experimental import pallas as pl
from jax.experimental.pallas import tpu as pltpu


def _round_up(n, m):
    return ((n + m - 1) // m) * m


def _cnn_kernel(x_ref, w1_ref, b1_ref, w2_ref, b2_ref, wfc_ref, bfc_ref, out_ref,
                *, K, T, p):
    """Whole forward for one batch tile.

    x_ref:   (rows, K*Cin)   wrapper-built conv1 im2col input (rows = batch_tile*T)
    w1_ref:  (K*Cin, Fp)     conv1 weight, im2col layout (k-major, channel-minor)
    b1_ref:  (1, Fp)         conv1 bias (f32)
    w2_ref:  (K, Fp, Fp)     conv2 weight, one (Fp, Fp) slab per tap
    b2_ref:  (1, Fp)         conv2 bias (f32)
    wfc_ref: (Fp, Lp)        fc weight, already scaled by 1/T (pool folded in)
    bfc_ref: (1, Lp)         fc bias (f32)
    out_ref: (1, bt, Lp)     lane-dense, sublane-dense logits (f32)
    """
    rows = x_ref.shape[0]
    Fp = b1_ref.shape[-1]
    bt = out_ref.shape[1]
    Lp = out_ref.shape[-1]
    cdt = x_ref.dtype

    # --- conv1 ("same"): one MXU dot on the wrapper im2col input (contraction K*Cin) ---
    h1 = jnp.dot(x_ref[...], w1_ref[...], preferred_element_type=jnp.float32)
    h1 = jnp.maximum(h1 + b1_ref[...], 0.0)                       # (rows, Fp) f32

    # Hoisted per-row local time index: one iota + one mod per grid step, reused by all taps.
    t_loc = lax.broadcasted_iota(jnp.int32, (rows, 1), 0) % T

    # --- conv2 ("same"): per-tap MXU accumulation (contraction Fp, lane-aligned).
    #     Rolls wrap at the block edge, but the boundary mask zeroes any position whose
    #     source time index falls outside its own length-T segment, so wrap is harmless. ---
    acc2 = jnp.dot(h1.astype(cdt), w2_ref[p], preferred_element_type=jnp.float32)
    for k in range(K):
        d = k - p
        if d == 0:
            continue
        rolled = pltpu.roll(h1, shift=(-d) % rows, axis=0)        # XLU sublane rotate
        mask = (t_loc < (T - d)) if d > 0 else (t_loc >= (-d))    # single compare per tap
        tap = jnp.where(mask, rolled, 0.0)
        acc2 = acc2 + jnp.dot(tap.astype(cdt), w2_ref[k],
                              preferred_element_type=jnp.float32)
    h2 = jnp.maximum(acc2 + b2_ref[...], 0.0)                     # (rows, Fp) f32

    # --- AdaptiveAvgPool1d(1): sum over time (1/T is folded into wfc) ---
    pooled = jnp.sum(h2.reshape(bt, T, Fp), axis=1)               # (bt, Fp) f32

    # --- Dropout: identity (eval); fc head.  Dense (bt, Lp) store. ---
    logits = jnp.dot(pooled.astype(cdt), wfc_ref[...],
                     preferred_element_type=jnp.float32) + bfc_ref[...]
    out_ref[...] = logits.reshape(1, bt, Lp)


def _pick_batch_tile(B, T, max_rows):
    """Largest divisor of B whose row block fits the VMEM budget, is sublane-aligned,
    and (when B >= 2) leaves at least 2 grid steps for dual-TC sharding on v7x."""
    cap = B // 2 if B >= 2 else B
    best = None
    for cand in range(1, cap + 1):
        if B % cand != 0:
            continue
        rows = cand * T
        if rows > max_rows or rows % 8 != 0:
            continue
        best = cand
    if best is None:
        # Fallback: smallest aligned divisor that fits; else the whole batch in one block.
        for cand in range(1, B + 1):
            if B % cand == 0 and cand * T <= max_rows and (cand * T) % 8 == 0:
                best = cand
                break
        if best is None:
            best = B
    return best


def cnn_forward(reg_ts, params, *, kernel_size, labels=None,
                compute_dtype=jnp.bfloat16, batch_tile=None):
    """Pallas forward pass. reg_ts: (B, T, F_in) — matches the PyTorch signature."""
    w1, b1, w2, b2, wfc, bfc = params
    B, T, Cin = reg_ts.shape
    K = kernel_size
    if K % 2 != 1:
        # PyTorch Conv1d(padding=K//2) with even K changes the output length (T+1);
        # this kernel implements the standard odd-K "same" convolution only.
        raise ValueError("cnn_forward requires an odd kernel_size")
    p = K // 2
    F = w1.shape[-1]
    L = wfc.shape[-1]
    Fp = _round_up(F, 128)
    Lp = _round_up(L, 128)
    cdt = compute_dtype
    KC = K * Cin

    # --- Generation-aware VMEM budget (conservative fallback is safe on v7x's 64 MiB/TC) ---
    try:
        vmem_cap = int(pltpu.get_tpu_info().vmem_capacity_bytes)
    except Exception:
        vmem_cap = 64 * 1024 * 1024
    vmem_limit = min(int(0.75 * vmem_cap), 96 * 1024 * 1024)
    in_itemsize = jnp.dtype(cdt).itemsize
    # Per-row working set: double-buffered input block (lane-padded to 128) + ~6 f32
    # (rows, 128) intermediates (h1 / rolled / tap / cast / acc2 / h2).
    bytes_per_row = 2 * 128 * in_itemsize + 6 * 128 * 4
    max_rows = max(T, min(8192, (vmem_limit // 2) // bytes_per_row))

    if batch_tile is None:
        batch_tile = _pick_batch_tile(B, T, max_rows)
    assert B % batch_tile == 0
    rows = batch_tile * T
    G = B // batch_tile

    # --- conv1 im2col in the wrapper (free XLA work; Cin -> K*Cin lanes is tiny) ---
    x = reg_ts.astype(cdt)
    taps = []
    for k in range(K):
        d = k - p
        if d < 0:
            tap = jnp.pad(x[:, :T + d, :], ((0, 0), (-d, 0), (0, 0)))
        elif d > 0:
            tap = jnp.pad(x[:, d:, :], ((0, 0), (0, d), (0, 0)))
        else:
            tap = x
        taps.append(tap)
    x2 = jnp.concatenate(taps, axis=-1).reshape(B * T, KC)

    # Lane-pad weights/biases to 128 lanes (zero padding; padded lanes stay exactly 0).
    w1p = jnp.zeros((KC, Fp), cdt).at[:, :F].set(w1.reshape(KC, F).astype(cdt))
    b1p = jnp.zeros((1, Fp), jnp.float32).at[0, :F].set(b1.astype(jnp.float32))
    w2p = jnp.zeros((K, Fp, Fp), cdt).at[:, :F, :F].set(w2.astype(cdt))
    b2p = jnp.zeros((1, Fp), jnp.float32).at[0, :F].set(b2.astype(jnp.float32))
    # Fold AdaptiveAvgPool's 1/T into the fc weight (kernel pools with a plain sum).
    wfcp = jnp.zeros((Fp, Lp), cdt).at[:F, :L].set((wfc / T).astype(cdt))
    bfcp = jnp.zeros((1, Lp), jnp.float32).at[0, :L].set(bfc.astype(jnp.float32))

    kern = functools.partial(_cnn_kernel, K=K, T=T, p=p)
    out = pl.pallas_call(
        kern,
        out_shape=jax.ShapeDtypeStruct((G, batch_tile, Lp), jnp.float32),
        grid=(G,),
        in_specs=[
            pl.BlockSpec((rows, KC), lambda b: (b, 0)),
            pl.BlockSpec((KC, Fp), lambda b: (0, 0)),
            pl.BlockSpec((1, Fp), lambda b: (0, 0)),
            pl.BlockSpec((K, Fp, Fp), lambda b: (0, 0, 0)),
            pl.BlockSpec((1, Fp), lambda b: (0, 0)),
            pl.BlockSpec((Fp, Lp), lambda b: (0, 0)),
            pl.BlockSpec((1, Lp), lambda b: (0, 0)),
        ],
        out_specs=pl.BlockSpec((1, batch_tile, Lp), lambda b: (b, 0, 0)),
        compiler_params=pltpu.CompilerParams(
            dimension_semantics=("parallel",),
            vmem_limit_bytes=vmem_limit,
        ),
    )(x2, w1p, b1p, w2p, b2p, wfcp, bfcp)

    logits = out.reshape(B, Lp)[:, :L]

    loss = None
    if labels is not None:
        # BCEWithLogitsLoss (mean reduction) — plain-JAX glue, not the hot path.
        lab = labels.astype(jnp.float32)
        lg = jnp.squeeze(logits) if (logits.shape[1] == 1 or lab.ndim == 1) else logits
        loss = jnp.mean(jnp.maximum(lg, 0.0) - lg * lab
                        + jnp.log1p(jnp.exp(-jnp.abs(lg))))
    return logits, loss


def cnn_reference(reg_ts, params, *, kernel_size):
    """Pure-JAX reference for correctness checking."""
    w1, b1, w2, b2, wfc, bfc = params
    K = kernel_size
    p = K // 2
    x = reg_ts.astype(jnp.float32)

    def conv(x, w, b):
        T = x.shape[1]
        xp = jnp.pad(x, ((0, 0), (p, p), (0, 0)))
        out = sum(jnp.einsum('btc,cf->btf', xp[:, k:k + T, :], w[k])
                  for k in range(K))
        return jax.nn.relu(out + b[None, None, :])

    h = conv(conv(x, w1, b1), w2, b2)
    pooled = jnp.mean(h, axis=1)
    return pooled @ wfc + bfc[None, :]


def init_params(key, input_dim, num_filters, kernel_size, num_labels):
    """Deterministic synthetic parameter init (shapes match the PyTorch module)."""
    k1, k2, k3, k4, k5, k6 = jax.random.split(key, 6)
    w1 = jax.random.normal(k1, (kernel_size, input_dim, num_filters), jnp.float32) * 0.2
    b1 = jax.random.normal(k2, (num_filters,), jnp.float32) * 0.1
    w2 = jax.random.normal(k3, (kernel_size, num_filters, num_filters), jnp.float32) * 0.2
    b2 = jax.random.normal(k4, (num_filters,), jnp.float32) * 0.1
    # PyTorch Linear stores (num_labels, num_filters); we keep it transposed.
    wfc = jax.random.normal(k5, (num_filters, num_labels), jnp.float32) * 0.2
    bfc = jax.random.normal(k6, (num_labels,), jnp.float32) * 0.1
    return (w1, b1, w2, b2, wfc, bfc)


if __name__ == "__main__":
    # Small shapes consistent with the module: (B, T, F_in) time-series input.
    B, T = 2, 16
    input_dim, num_filters, kernel_size, num_labels = 4, 8, 3, 3

    key = jax.random.PRNGKey(0)
    kx, klab, kp = jax.random.split(key, 3)
    reg_ts = jax.random.normal(kx, (B, T, input_dim), jnp.float32)
    labels = (jax.random.uniform(klab, (B, num_labels)) > 0.5).astype(jnp.float32)
    params = init_params(kp, input_dim, num_filters, kernel_size, num_labels)

    ref = cnn_reference(reg_ts, params, kernel_size=kernel_size)

    # f32 operand path: auto batch_tile=1 -> grid=(2,) "parallel" (>=2 steps, dual-TC safe).
    logits, loss = cnn_forward(reg_ts, params, kernel_size=kernel_size, labels=labels,
                               compute_dtype=jnp.float32)
    logits = jax.block_until_ready(logits)
    loss = jax.block_until_ready(loss)
    assert logits.shape == (B, num_labels)
    assert jnp.allclose(logits, ref, atol=1e-3, rtol=1e-3), (logits, ref)
    assert jnp.isfinite(loss)

    # Default bf16 MXU-operand path (f32 accumulation / element-wise math inside the kernel).
    logits_bf16, _ = cnn_forward(reg_ts, params, kernel_size=kernel_size)
    logits_bf16 = jax.block_until_ready(logits_bf16)
    assert logits_bf16.shape == (B, num_labels)
    assert jnp.allclose(logits_bf16, ref, atol=1e-1, rtol=1e-1), (logits_bf16, ref)

    print("KERNEL_OK")
</pallas_src>

<mosaic_0001>
module attributes {stable_mosaic.version = 11 : i64} {
  func.func @_cnn_kernel(%arg0: i32, %arg1: memref<16x12xf32, #tpu.memory_space<vmem>>, %arg2: memref<12x128xf32, #tpu.memory_space<vmem>>, %arg3: memref<1x128xf32, #tpu.memory_space<vmem>>, %arg4: memref<3x128x128xf32, #tpu.memory_space<vmem>>, %arg5: memref<1x128xf32, #tpu.memory_space<vmem>>, %arg6: memref<128x128xf32, #tpu.memory_space<vmem>>, %arg7: memref<1x128xf32, #tpu.memory_space<vmem>>, %arg8: memref<1x1x128xf32, #tpu.memory_space<vmem>>) attributes {dimension_semantics = [#tpu.dimension_semantics<parallel>], iteration_bounds = array<i64: 2>, scalar_prefetch = 0 : i64, scratch_operands = 0 : i64, tpu.core_type = #tpu.core_type<tc>, window_params = [{transform_indices = @transform_0, window_bounds = array<i64: 16, 12>}, {pipeline_mode = #tpu.pipeline_mode<synchronous>, transform_indices = @transform_1, window_bounds = array<i64: 12, 128>}, {pipeline_mode = #tpu.pipeline_mode<synchronous>, transform_indices = @transform_2, window_bounds = array<i64: 1, 128>}, {pipeline_mode = #tpu.pipeline_mode<synchronous>, transform_indices = @transform_3, window_bounds = array<i64: 3, 128, 128>}, {pipeline_mode = #tpu.pipeline_mode<synchronous>, transform_indices = @transform_4, window_bounds = array<i64: 1, 128>}, {pipeline_mode = #tpu.pipeline_mode<synchronous>, transform_indices = @transform_5, window_bounds = array<i64: 128, 128>}, {pipeline_mode = #tpu.pipeline_mode<synchronous>, transform_indices = @transform_6, window_bounds = array<i64: 1, 128>}, {transform_indices = @transform_7, window_bounds = array<i64: 1, 1, 128>}]} {
    %c0 = arith.constant 0 : index
    %c0_0 = arith.constant 0 : index
    %0 = vector.load %arg1[%c0, %c0_0] : memref<16x12xf32, #tpu.memory_space<vmem>>, vector<16x12xf32>
    %c0_1 = arith.constant 0 : index
    %c0_2 = arith.constant 0 : index
    %1 = vector.load %arg2[%c0_1, %c0_2] : memref<12x128xf32, #tpu.memory_space<vmem>>, vector<12x128xf32>
    %cst = arith.constant dense<0.000000e+00> : vector<16x128xf32>
    %2 = tpu.matmul %0, %1, %cst {dimension_numbers = #tpu.dot_dimension_numbers<[1], [0], [0], [1], [0, 0, 1, 1], [], []>} : vector<16x12xf32>, vector<12x128xf32>, vector<16x128xf32> -> vector<16x128xf32>
    %c0_3 = arith.constant 0 : index
    %c0_4 = arith.constant 0 : index
    %3 = vector.load %arg3[%c0_3, %c0_4] : memref<1x128xf32, #tpu.memory_space<vmem>>, vector<1x128xf32>
    %4 = vector.broadcast %3 : vector<1x128xf32> to vector<16x128xf32>
    %5 = arith.addf %2, %4 : vector<16x128xf32>
    %cst_5 = arith.constant 0.000000e+00 : f32
    %6 = vector.broadcast %cst_5 : f32 to vector<16x128xf32>
    %7 = arith.maximumf %5, %6 : vector<16x128xf32>
    %8 = tpu.iota {dimensions = array<i32: 0>} : vector<16x1xi32>
    %c16_i32 = arith.constant 16 : i32
    %c0_i32 = arith.constant 0 : i32
    %9 = arith.cmpi eq, %c16_i32, %c0_i32 : i32
    %c1_i32 = arith.constant 1 : i32
    %10 = arith.select %9, %c1_i32, %c16_i32 : i32
    %11 = vector.broadcast %10 : i32 to vector<16x1xi32>
    %12 = arith.remsi %8, %11 : vector<16x1xi32>
    %c0_i32_6 = arith.constant 0 : i32
    %13 = vector.broadcast %c0_i32_6 : i32 to vector<16x1xi32>
    %14 = arith.cmpi ne, %12, %13 : vector<16x1xi32>
    %c0_i32_7 = arith.constant 0 : i32
    %15 = vector.broadcast %c0_i32_7 : i32 to vector<16x1xi32>
    %16 = arith.cmpi slt, %12, %15 : vector<16x1xi32>
    %c0_i32_8 = arith.constant 0 : i32
    %17 = arith.cmpi slt, %10, %c0_i32_8 : i32
    %18 = vector.broadcast %17 : i1 to vector<16x1xi1>
    %19 = vector.broadcast %18 : vector<16x1xi1> to vector<16x1xi1>
    %20 = arith.xori %16, %19 : vector<16x1xi1>
    %21 = arith.andi %20, %14 : vector<16x1xi1>
    %22 = vector.broadcast %10 : i32 to vector<16x1xi32>
    %23 = arith.addi %12, %22 : vector<16x1xi32>
    %24 = arith.select %21, %23, %12 : vector<16x1xi1>, vector<16x1xi32>
    %c1 = arith.constant 1 : index
    %c0_9 = arith.constant 0 : index
    %c0_10 = arith.constant 0 : index
    %25 = vector.load %arg4[%c1, %c0_9, %c0_10] : memref<3x128x128xf32, #tpu.memory_space<vmem>>, vector<1x128x128xf32>
    %26 = vector.shape_cast %25 : vector<1x128x128xf32> to vector<128x128xf32>
    %cst_11 = arith.constant dense<0.000000e+00> : vector<16x128xf32>
    %27 = tpu.matmul %7, %26, %cst_11 {dimension_numbers = #tpu.dot_dimension_numbers<[1], [0], [0], [1], [0, 0, 1, 1], [], []>} : vector<16x128xf32>, vector<128x128xf32>, vector<16x128xf32> -> vector<16x128xf32>
    %c1_i32_12 = arith.constant 1 : i32
    %28 = tpu.dynamic_rotate %7 by %c1_i32_12 dim 0 : vector<16x128xf32>, i32 -> vector<16x128xf32>
    %c1_i32_13 = arith.constant 1 : i32
    %29 = vector.broadcast %c1_i32_13 : i32 to vector<16x1xi32>
    %30 = arith.cmpi sge, %24, %29 : vector<16x1xi32>
    %cst_14 = arith.constant 0.000000e+00 : f32
    %31 = vector.shape_cast %30 : vector<16x1xi1> to vector<16x1xi1>
    %32 = vector.broadcast %31 : vector<16x1xi1> to vector<16x128xi1>
    %33 = vector.broadcast %cst_14 : f32 to vector<16x128xf32>
    %34 = arith.select %32, %28, %33 : vector<16x128xi1>, vector<16x128xf32>
    %c0_15 = arith.constant 0 : index
    %c0_16 = arith.constant 0 : index
    %c0_17 = arith.constant 0 : index
    %35 = vector.load %arg4[%c0_15, %c0_16, %c0_17] : memref<3x128x128xf32, #tpu.memory_space<vmem>>, vector<1x128x128xf32>
    %36 = vector.shape_cast %35 : vector<1x128x128xf32> to vector<128x128xf32>
    %cst_18 = arith.constant dense<0.000000e+00> : vector<16x128xf32>
    %37 = tpu.matmul %34, %36, %cst_18 {dimension_numbers = #tpu.dot_dimension_numbers<[1], [0], [0], [1], [0, 0, 1, 1], [], []>} : vector<16x128xf32>, vector<128x128xf32>, vector<16x128xf32> -> vector<16x128xf32>
    %38 = arith.addf %27, %37 : vector<16x128xf32>
    %c15_i32 = arith.constant 15 : i32
    %39 = tpu.dynamic_rotate %7 by %c15_i32 dim 0 : vector<16x128xf32>, i32 -> vector<16x128xf32>
    %c15_i32_19 = arith.constant 15 : i32
    %40 = vector.broadcast %c15_i32_19 : i32 to vector<16x1xi32>
    %41 = arith.cmpi slt, %24, %40 : vector<16x1xi32>
    %cst_20 = arith.constant 0.000000e+00 : f32
    %42 = vector.shape_cast %41 : vector<16x1xi1> to vector<16x1xi1>
    %43 = vector.broadcast %42 : vector<16x1xi1> to vector<16x128xi1>
    %44 = vector.broadcast %cst_20 : f32 to vector<16x128xf32>
    %45 = arith.select %43, %39, %44 : vector<16x128xi1>, vector<16x128xf32>
    %c2 = arith.constant 2 : index
    %c0_21 = arith.constant 0 : index
    %c0_22 = arith.constant 0 : index
    %46 = vector.load %arg4[%c2, %c0_21, %c0_22] : memref<3x128x128xf32, #tpu.memory_space<vmem>>, vector<1x128x128xf32>
    %47 = vector.shape_cast %46 : vector<1x128x128xf32> to vector<128x128xf32>
    %cst_23 = arith.constant dense<0.000000e+00> : vector<16x128xf32>
    %48 = tpu.matmul %45, %47, %cst_23 {dimension_numbers = #tpu.dot_dimension_numbers<[1], [0], [0], [1], [0, 0, 1, 1], [], []>} : vector<16x128xf32>, vector<128x128xf32>, vector<16x128xf32> -> vector<16x128xf32>
    %49 = arith.addf %38, %48 : vector<16x128xf32>
    %c0_24 = arith.constant 0 : index
    %c0_25 = arith.constant 0 : index
    %50 = vector.load %arg5[%c0_24, %c0_25] : memref<1x128xf32, #tpu.memory_space<vmem>>, vector<1x128xf32>
    %51 = vector.broadcast %50 : vector<1x128xf32> to vector<16x128xf32>
    %52 = arith.addf %49, %51 : vector<16x128xf32>
    %cst_26 = arith.constant 0.000000e+00 : f32
    %53 = vector.broadcast %cst_26 : f32 to vector<16x128xf32>
    %54 = arith.maximumf %52, %53 : vector<16x128xf32>
    %55 = vector.shape_cast %54 : vector<16x128xf32> to vector<1x16x128xf32>
    %cst_27 = arith.constant dense<0.000000e+00> : vector<1x128xf32>
    %56 = vector.multi_reduction <add>, %55, %cst_27 [1] : vector<1x16x128xf32> to vector<1x128xf32>
    %c0_28 = arith.constant 0 : index
    %c0_29 = arith.constant 0 : index
    %57 = vector.load %arg6[%c0_28, %c0_29] : memref<128x128xf32, #tpu.memory_space<vmem>>, vector<128x128xf32>
    %cst_30 = arith.constant dense<0.000000e+00> : vector<1x128xf32>
    %58 = tpu.matmul %56, %57, %cst_30 {dimension_numbers = #tpu.dot_dimension_numbers<[1], [0], [0], [1], [0, 0, 1, 1], [], []>} : vector<1x128xf32>, vector<128x128xf32>, vector<1x128xf32> -> vector<1x128xf32>
    %c0_31 = arith.constant 0 : index
    %c0_32 = arith.constant 0 : index
    %59 = vector.load %arg7[%c0_31, %c0_32] : memref<1x128xf32, #tpu.memory_space<vmem>>, vector<1x128xf32>
    %60 = arith.addf %58, %59 : vector<1x128xf32>
    %61 = vector.shape_cast %60 : vector<1x128xf32> to vector<1x1x128xf32>
    %c0_33 = arith.constant 0 : index
    %c0_34 = arith.constant 0 : index
    %c0_35 = arith.constant 0 : index
    %62 = vector.load %arg8[%c0_33, %c0_34, %c0_35] : memref<1x1x128xf32, #tpu.memory_space<vmem>>, vector<1x1x128xf32>
    tpu.vector_store %arg8[%c0_33, %c0_34, %c0_35], %61 {strides = array<i32>} : memref<1x1x128xf32, #tpu.memory_space<vmem>>, vector<1x1x128xf32>,
    return
  }
  func.func @transform_0(%arg0: i32) -> (i32, i32) {
    %c0_i32 = arith.constant 0 : i32
    %c0_i32_0 = arith.constant 0 : i32
    return %arg0, %c0_i32 : i32, i32
  }
  func.func @transform_1(%arg0: i32) -> (i32, i32) {
    %c0_i32 = arith.constant 0 : i32
    %c0_i32_0 = arith.constant 0 : i32
    %c0_i32_1 = arith.constant 0 : i32
    return %c0_i32, %c0_i32_0 : i32, i32
  }
  func.func @transform_2(%arg0: i32) -> (i32, i32) {
    %c0_i32 = arith.constant 0 : i32
    %c0_i32_0 = arith.constant 0 : i32
    %c0_i32_1 = arith.constant 0 : i32
    return %c0_i32, %c0_i32_0 : i32, i32
  }
  func.func @transform_3(%arg0: i32) -> (i32, i32, i32) {
    %c0_i32 = arith.constant 0 : i32
    %c0_i32_0 = arith.constant 0 : i32
    %c0_i32_1 = arith.constant 0 : i32
    %c0_i32_2 = arith.constant 0 : i32
    return %c0_i32, %c0_i32_0, %c0_i32_1 : i32, i32, i32
  }
  func.func @transform_4(%arg0: i32) -> (i32, i32) {
    %c0_i32 = arith.constant 0 : i32
    %c0_i32_0 = arith.constant 0 : i32
    %c0_i32_1 = arith.constant 0 : i32
    return %c0_i32, %c0_i32_0 : i32, i32
  }
  func.func @transform_5(%arg0: i32) -> (i32, i32) {
    %c0_i32 = arith.constant 0 : i32
    %c0_i32_0 = arith.constant 0 : i32
    %c0_i32_1 = arith.constant 0 : i32
    return %c0_i32, %c0_i32_0 : i32, i32
  }
  func.func @transform_6(%arg0: i32) -> (i32, i32) {
    %c0_i32 = arith.constant 0 : i32
    %c0_i32_0 = arith.constant 0 : i32
    %c0_i32_1 = arith.constant 0 : i32
    return %c0_i32, %c0_i32_0 : i32, i32
  }
  func.func @transform_7(%arg0: i32) -> (i32, i32, i32) {
    %c0_i32 = arith.constant 0 : i32
    %c0_i32_0 = arith.constant 0 : i32
    %c0_i32_1 = arith.constant 0 : i32
    return %arg0, %c0_i32, %c0_i32_0 : i32, i32, i32
  }
}

</mosaic_0001>

<bundles_post_ra>
// kernel: tpu_custom_call.1
= control target key start
LH: loop header
LB: loop body
LE: loop exit
PB: predicated region body
PF: predicated region fallthrough
CT: control target
= control target key end

     0   :  { %12 = vsyncpa [#allocation3], 0  ;;  %s1582_s0 = inlined_call_operand.vmem [shape: f32[32,12], index: 0, kind: input, shape index: {}]   ;;  %s1583_s1 = inlined_call_operand.vmem [shape: f32[12,128], index: 1, kind: input, shape index: {}]   ;;  %s1584_s2 = inlined_call_operand.vmem [shape: f32[1,128], index: 2, kind: input, shape index: {}]   ;;  %s1585_s3 = inlined_call_operand.hbm [shape: f32[3,128,128], index: 3, kind: input, shape index: {}]   ;;  %s1586_s4 = inlined_call_operand.vmem [shape: f32[1,128], index: 4, kind: input, shape index: {}]   ;;  %s1587_s5 = inlined_call_operand.hbm [shape: f32[128,128], index: 5, kind: input, shape index: {}]   ;;  %s1588_s6 = inlined_call_operand.vmem [shape: f32[1,128], index: 6, kind: input, shape index: {}]   ;;  %s1589_s7 = inlined_call_operand.hbm [shape: f32[2,1,128], index: 7, kind: output, shape index: {}]  }
   0x1   :  { %13 = vsyncpa [#allocation6], 0 }
   0x2   :  { %14 = vsyncpa [#allocation4], 0 }
   0x3   :  { %16 = vsyncpa [#allocation4 + $0x1], 0  ;;  %s1408_s24 = smov 0   ;;  %s1410_s25 = smov 0  }
   0x4   :  { %s1412_s26 = smov 0   ;;  %s1414_s27 = smov 0  }
   0x5 LB: > { %s1429_s28 = sadd.s32 4294967295, %s1359_s27   ;;  %s933_s29 = sadd.s32 4294967294, %s1359_s27   ;;  %s1359_s27 = sphi %s1414_s27, %s1603_s27   ;;  %s1355_s26 = sphi %s1412_s26, %s1602_s26   ;;  %s1351_s25 = sphi %s1410_s25, %s1601_s25   ;;  %s1347_s24 = sphi %s1408_s24, %s1600_s24  }
   0x6   : > { %s1433_s30 = sadd.s32 1, %s1359_s27   ;;  %s181_s8 = sadd.s32 1, %s1355_s26 }
   0x7   : > { %s178_s9 = ssub.s32 %s1359_s27, %s1433_s30  ;;  %p191_p0 = scmp.ne.s32.totalorder %s1355_s26, %s1351_s25 }
   0x8   : > { %p179_p1 = scmp.eq.s32.totalorder %s178_s9, 0  ;;  %p192_p2 = scmp.eq.s32.totalorder %s1429_s28, 1 }
   0x9   : > { %p197_p3 = scmp.ne.s32.totalorder %s1351_s25, %s1347_s24  ;;  %p198_p4 = scmp.eq.s32.totalorder %s933_s29, 1 }
   0xa   : > { %s1444_s10 = scalar_select %p179_p1, %s1355_s26, %s181_s8  }
   0xb   : > { %p1446_p5 = por %p192_p2, %p191_p0  ;;  %p1450_p6 = por %p198_p4, %p197_p3 }
   0xc   : > { %p934_p7 = scmp.ge.s32.totalorder %s1359_s27, 1  ;;  %p205_p8 = scmp.lt.s32.totalorder %s1359_s27, 3 }
   0xd   : > { %s1592_s12 = scalar_select %p1450_p6, 1, 0 }
   0xe   : > { %p1590_p9 = scmp.eq.s32.totalorder %s1429_s28, 0  ;;  %p1457_p10 = pnand %p934_p7, %p205_p8 }
   0xf   : > { %s1361_s14 = smov [#allocation2]   ;;  %s1362_s17 = smov [#allocation5]  }
  0x10   : > { %s223_s15 = sshll.u32 %s1361_s14, 4  ;;  %p1185_p11 = pneg %p1457_p10  ;;  %s224_s15 = int_to_ptr.vmem [resolvable:$true] %s223_s15 }
  0x11   : > { %s239_s18 = sshll.u32 %s1362_s17, 4  ;;  %s1250_s19 = scalar_lea.vmem %s224_s15, 6144  ;;  %s240_s18 = int_to_ptr.vmem [resolvable:$true] %s239_s18 }
  0x12   : > { %p1465_p12 = pnand %p1590_p9, %p1185_p11  ;;  %p1251_p0 = scmp.ne.s32.totalorder %s224_s15, %s1250_s19 }
  0x13   : > { %p1258_p3 = scmp.lt.s32.totalorder %s224_s15, %s224_s15  ;;  %p1259_p4 = scmp.lt.s32.totalorder %s1250_s19, %s1250_s19 }
  0x14   : > { %p1241_p13 = pneg %p1465_p12 }
  0x15   : > { %p1260_p7 = por %p1259_p4, %p1258_p3 }
  0x16   : > { %p1253_p1 = pnand %p1251_p0, %p1241_p13 }
  0x18   : > { %p1254_p2 = pneg %p1253_p1 }
  0x1a   : > { %p1261_p8 = pnand %p1260_p7, %p1254_p2 }
  0x1c   : > { %1264 = shalt.err (!%p1261_p8)
}
  0x1d   : > { %s1363_s20 = smov 128   ;;  %s1364_s21 = smov 8  }
  0x1e   : > { %1188 = dma.hbm_to_vmem [thread:$0]  (!%p1465_p12), %s1585_s3, 6144, %s224_s15, [#allocation3], %s1363_s20, %s1363_s20, %s1364_s21  }
  0x1f   : > { %s1276_s29 = scalar_lea.vmem %s240_s18, 2048  ;;  %p1284_p9 = scmp.lt.s32.totalorder %s240_s18, %s240_s18 }
  0x20   : > { %p1277_p11 = scmp.ne.s32.totalorder %s240_s18, %s1276_s29  ;;  %p1285_p6 = scmp.lt.s32.totalorder %s1276_s29, %s1276_s29 }
  0x22   : > { %p1279_p0 = pnand %p1277_p11, %p1241_p13  ;;  %p1286_p3 = por %p1285_p6, %p1284_p9 }
  0x24   : > { %p1280_p1 = pneg %p1279_p0 }
  0x26   : > { %p1287_p2 = pnand %p1286_p3, %p1280_p1 }
  0x28   : > { %1290 = shalt.err (!%p1287_p2)
}
  0x29   : > { %1191 = dma.hbm_to_vmem [thread:$0]  (!%p1465_p12), %s1587_s5, 2048, %s240_s18, [#allocation6], %s1363_s20, %s1363_s20, %s1364_s21  }
  0x2a   : > { %267 = sbr.rel (%p1457_p10) target bundleno = 717 (0x2cd), region = 48  ;;  %p1595_p4 = scmp.eq.s32.totalorder (!%p1457_p10), %s1429_s28, 0 }
  0x2f   : > { %1334 = dma.done.wait (%p1595_p4), [#allocation3], 6144   ;;  %p1596_p13 = pmov %p1595_p4 }
  0x30   : > { %p1597_p7 = pmov %p1595_p4 }
  0x31   : > { %1336 = vsyncadd (%p1596_p13), [#allocation3], 4294961152 }
  0x32   : > { %1338 = dma.done.wait (%p1597_p7), [#allocation6], 2048   ;;  %p1598_p6 = pmov %p1595_p4 }
  0x33   : > { %s941_s14 = sshll.u32 %s1429_s28, 1  ;;  %vm326_vm0 = vcmask 1043456   ;;  %vm319_vm1 = vcmask 97280   ;;  %v311_v0 = vld [vmem:[%s1583_s1 + $0x8] sm:$0xf]  ;;  %v310_v1 = vld [vmem:[%s1583_s1] sm:$0xff]  ;;  %v407_v37 = vlaneseq }
  0x34   : > { %1340 = vsyncadd (%p1598_p6), [#allocation6], 4294965248  ;;  %p303_p9 = scmp.lt.s32.totalorder %s941_s14, 3  ;;  %1028 = vmatprep.subr.msk.mxu0 %vm326_vm0, %v311_v0  ;;  %v479_v3 = vld [vmem:[#allocation2 + $0x78] sm:$0xff]  ;;  %v478_v6 = vld [vmem:[#allocation2 + $0x70] sm:$0xff]  ;;  %vm1366_vm6 = vmmov 0  }
  0x35   : > { %1029 = vmatpush3.msk.msra.mxu0 %vm326_vm0, %v311_v0  ;;  %v450_v5 = vld [vmem:[#allocation2 + $0xf8] sm:$0xff]  ;;  %1035 = vmatprep.subr.mxu1 %v479_v3  ;;  %v449_v7 = vld [vmem:[#allocation2 + $0xf0] sm:$0xff]  ;;  %v477_v8 = vld [vmem:[#allocation2 + $0x68] sm:$0xff]  ;;  %v1512_v39 = vshrl.u32 %v407_v37, 7  ;;  %s300_s9 = sand.u32 1, %s1351_s25   ;;  %s950_s13 = sshll.u32 %s1429_s28, 4 }
  0x36   : > { %s1605_s14 = smov (!%p303_p9, %s941_s14), 3  ;;  %1030 = vmatprep.subr.mxu0 %v310_v1  ;;  %1036 = vmatpush3.msra.mxu1 %v479_v3  ;;  %v448_v9 = vld [vmem:[#allocation2 + $0xe8] sm:$0xff]  ;;  %v476_v10 = vld [vmem:[#allocation2 + $0x60] sm:$0xff]  ;;  %v475_v12 = vld [vmem:[#allocation2 + $0x58] sm:$0xff]  ;;  %s301_s16 = scalar_lea.vmem [#allocation7], %s300_s9 }
  0x37   : > { %s942_s15 = sshll.u32 %s1605_s14, 3  ;;  %1031 = vmatpush3.msra.mxu0 %v310_v1  ;;  %1037 = vmatprep.subr.mxu1 %v478_v6  ;;  %v447_v11 = vld [vmem:[#allocation2 + $0xe0] sm:$0xff]  ;;  %v446_v13 = vld [vmem:[#allocation2 + $0xd8] sm:$0xff]  ;;  %v474_v14 = vld [vmem:[#allocation2 + $0x50] sm:$0xff]  ;;  %v414_v45 = vand.u32 15, %v1512_v39  ;;  %vm453_vm2 = vcmp.lt.s32.totalorder %v1512_v39, 1  ;;  %s1547_s20 = scalar_lea.hbm %s1589_s7, %s950_s13 }
  0x38   : > { %s306_s17 = scalar_lea.vmem %s1582_s0, %s942_s15  ;;  %1070 = vmatprep.subr.mxu0 %v450_v5  ;;  %1038 = vmatpush3.msra.mxu1 %v478_v6  ;;  %v445_v15 = vld [vmem:[#allocation2 + $0xd0] sm:$0xff]  ;;  %v473_v16 = vld [vmem:[#allocation2 + $0x48] sm:$0xff]  ;;  %v472_v18 = vld [vmem:[#allocation2 + $0x40] sm:$0xff]  ;;  %vm632_vm4 = vcmp.lt.s32.totalorder %v1512_v39, 7  ;;  %s844_s21 = scalar_lea.sflag [#allocation4], %s300_s9 }
  0x39   : > { %v308_v2 = vld [vmem:[%s306_s17] sm:$0xff]  ;;  %v309_v4 = vld [vmem:[%s306_s17 + $0x8] sm:$0xff]  ;;  %1039 = vmatprep.subr.mxu1 %v477_v8  ;;  %v471_v20 = vld [vmem:[#allocation2 + $0x38] sm:$0xff]  ;;  %vm456_vm3 = vcmp.ge.s32.totalorder %v414_v45, 1  ;;  %s856_s17 = sshll.u32 %s301_s16, 4  ;;  %s1367_s23 = smov [#allocation7]   ;;  %s857_s17 = int_to_ptr.vmem [resolvable:$true] %s856_s17 }
  0x3a   : > { %1032 = vmatprep.mubr.msk.f32.mxu0 %vm319_vm1, %v308_v2  ;;  %1040 = vmatpush3.msra.mxu1 %v477_v8  ;;  %v444_v17 = vld [vmem:[#allocation2 + $0xc8] sm:$0xff]  ;;  %v443_v19 = vld [vmem:[#allocation2 + $0xc0] sm:$0xff]  ;;  %v442_v21 = vld [vmem:[#allocation2 + $0xb8] sm:$0xff]  ;;  %v409_v2 = vadd.s32 8, %v1512_v39  ;;  %s1291_s22 = scalar_lea.vmem %s857_s17, 16  ;;  %s1295_s28 = sshll.u32 %s1367_s23, 4  ;;  %s1296_s28 = int_to_ptr.vmem [resolvable:$false] %s1295_s28 }
  0x3b   : > { %1033 = vmatmul.mubr.msk.f32.vlgmr.msra.gmra.mxu0 %vm319_vm1, %v309_v4  ;;  %1041 = vmatprep.subr.mxu1 %v476_v10  ;;  %v470_v22 = vld [vmem:[#allocation2 + $0x30] sm:$0xff]  ;;  %v469_v24 = vld [vmem:[#allocation2 + $0x28] sm:$0xff]  ;;  %v439_v26 = vld [vmem:[#allocation2 + $0xa0] sm:$0xff]  ;;  %p1292_p10 = scmp.ne.s32.totalorder %s857_s17, %s1291_s22  ;;  %s1297_s29 = scalar_lea.vmem %s1296_s28, 32 }
  0x3c   : > { %1071 = vmatpush3.msra.mxu0 %v450_v5  ;;  %1042 = vmatpush3.msra.mxu1 %v476_v10  ;;  %v441_v23 = vld [vmem:[#allocation2 + $0xb0] sm:$0xff]  ;;  %v440_v25 = vld [vmem:[#allocation2 + $0xa8] sm:$0xff]  ;;  %v468_v27 = vld [vmem:[#allocation2 + $0x20] sm:$0xff]  ;;  %v421_v5 = vand.u32 15, %v409_v2  ;;  %p1298_p11 = scmp.lt.s32.totalorder %s857_s17, %s1296_s28  ;;  %p1299_p0 = scmp.lt.s32.totalorder %s1297_s29, %s1291_s22 }
  0x3d   : > { %1072 = vmatprep.subr.mxu0 %v449_v7  ;;  %1043 = vmatprep.subr.mxu1 %v475_v12  ;;  %v438_v28 = vld [vmem:[#allocation2 + $0x98] sm:$0xff]  ;;  %v437_v30 = vld [vmem:[#allocation2 + $0x90] sm:$0xff]  ;;  %v436_v32 = vld [vmem:[#allocation2 + $0x88] sm:$0xff]  ;;  %p1293_p12 = pnand %p1292_p10, %p1446_p5 }
  0x3e   : > { %1073 = vmatpush3.msra.mxu0 %v449_v7  ;;  %1044 = vmatpush3.msra.mxu1 %v475_v12  ;;  %v467_v29 = vld [vmem:[#allocation2 + $0x18] sm:$0xff]  ;;  %v466_v31 = vld [vmem:[#allocation2 + $0x10] sm:$0xff]  ;;  %v465_v33 = vld [vmem:[#allocation2 + $0x8] sm:$0xff]  ;;  %vm636_vm5 = vcmp.lt.s32.totalorder %v421_v5, 15  ;;  %p1300_p1 = por %p1299_p0, %p1298_p11 }
  0x3f   : > { %1074 = vmatprep.subr.mxu0 %v448_v9  ;;  %1045 = vmatprep.subr.mxu1 %v474_v14  ;;  %v435_v34 = vld [vmem:[#allocation2 + $0x80] sm:$0xff]  ;;  %v659_v36 = vld [vmem:[#allocation2 + $0x178] sm:$0xff]  ;;  %v658_v53 = vld [vmem:[#allocation2 + $0x170] sm:$0xff]  ;;  %p1294_p8 = pneg %p1293_p12 }
  0x40   : > { %1075 = vmatpush3.msra.mxu0 %v448_v9  ;;  %1046 = vmatpush3.msra.mxu1 %v474_v14  ;;  %v464_v35 = vld [vmem:[#allocation2] sm:$0xff]  ;;  %v657_v55 = vld [vmem:[#allocation2 + $0x168] sm:$0xff]  ;;  %v655_v57 = vld [vmem:[#allocation2 + $0x158] sm:$0xff]  ;;  %v1365_v9 = vmov 0.0  }
  0x41   : > { %1076 = vmatprep.subr.mxu0 %v447_v11  ;;  %1047 = vmatprep.subr.mxu1 %v473_v16  ;;  %v943_v38 = vld [vmem:[%s1584_s2] ss:$0 sm:$0xff]  ;;  %v654_v58 = vld [vmem:[#allocation2 + $0x150] sm:$0xff]  ;;  %v653_v59 = vld [vmem:[#allocation2 + $0x148] sm:$0xff]  ;;  %p1301_p3 = pnand %p1300_p1, %p1294_p8 }
  0x42   : > { %1077 = vmatpush3.msra.mxu0 %v447_v11  ;;  %1048 = vmatpush3.msra.mxu1 %v473_v16  ;;  %v656_v56 = vld [vmem:[#allocation2 + $0x160] sm:$0xff]  ;;  %v651_v61 = vld [vmem:[#allocation2 + $0x138] sm:$0xff]  ;;  %v650_v62 = vld [vmem:[#allocation2 + $0x130] sm:$0xff] }
  0x43   : > { %1078 = vmatprep.subr.mxu0 %v446_v13  ;;  %1049 = vmatprep.subr.mxu1 %v472_v18  ;;  %v652_v60 = vld [vmem:[#allocation2 + $0x140] sm:$0xff]  ;;  %v649_v63 = vld [vmem:[#allocation2 + $0x128] sm:$0xff]  ;;  %v647_v1 = vld [vmem:[#allocation2 + $0x118] sm:$0xff] }
  0x44   : > { %1079 = vmatpush3.msra.mxu0 %v446_v13  ;;  %1050 = vmatpush3.msra.mxu1 %v472_v18  ;;  %v648_v0 = vld [vmem:[#allocation2 + $0x120] sm:$0xff]  ;;  %v646_v3 = vld [vmem:[#allocation2 + $0x110] sm:$0xff]  ;;  %v645_v4 = vld [vmem:[#allocation2 + $0x108] sm:$0xff] }
  0x45   : > { %1080 = vmatprep.subr.mxu0 %v445_v15  ;;  %1051 = vmatprep.subr.mxu1 %v471_v20  ;;  %v644_v6 = vld [vmem:[#allocation2 + $0x100] sm:$0xff]  ;;  %v770_v8 = vld [vmem:[#allocation5 + $0x78] sm:$0xff]  ;;  %v769_v10 = vld [vmem:[#allocation5 + $0x70] sm:$0xff] }
  0x46   : > { %1081 = vmatpush3.msra.mxu0 %v445_v15  ;;  %1052 = vmatpush3.msra.mxu1 %v471_v20  ;;  %v768_v11 = vld [vmem:[#allocation5 + $0x68] sm:$0xff]  ;;  %v767_v12 = vld [vmem:[#allocation5 + $0x60] sm:$0xff]  ;;  %v766_v13 = vld [vmem:[#allocation5 + $0x58] sm:$0xff] }
  0x47   : > { %1082 = vmatprep.subr.mxu0 %v444_v17  ;;  %1053 = vmatprep.subr.mxu1 %v470_v22  ;;  %v765_v14 = vld [vmem:[#allocation5 + $0x50] sm:$0xff]  ;;  %v764_v15 = vld [vmem:[#allocation5 + $0x48] sm:$0xff]  ;;  %v763_v16 = vld [vmem:[#allocation5 + $0x40] sm:$0xff] }
  0x48   : > { %1083 = vmatpush3.msra.mxu0 %v444_v17  ;;  %1054 = vmatpush3.msra.mxu1 %v470_v22  ;;  %v762_v17 = vld [vmem:[#allocation5 + $0x38] sm:$0xff]  ;;  %v761_v18 = vld [vmem:[#allocation5 + $0x30] sm:$0xff]  ;;  %v759_v20 = vld [vmem:[#allocation5 + $0x20] sm:$0xff] }
  0x49   : > { %1084 = vmatprep.subr.mxu0 %v443_v19  ;;  %1055 = vmatprep.subr.mxu1 %v469_v24  ;;  %v757_v22 = vld [vmem:[#allocation5 + $0x10] sm:$0xff] }
  0x4a   : > { %1085 = vmatpush3.msra.mxu0 %v443_v19  ;;  %1056 = vmatpush3.msra.mxu1 %v469_v24  ;;  %v760_v19 = vld [vmem:[#allocation5 + $0x28] sm:$0xff]  ;;  %v755_v24 = vld [vmem:[#allocation5] sm:$0xff] }
  0x4b   : > { %1086 = vmatprep.subr.mxu0 %v442_v21  ;;  %1057 = vmatprep.subr.mxu1 %v468_v27 }
  0x4c   : > { %1087 = vmatpush3.msra.mxu0 %v442_v21  ;;  %1058 = vmatpush3.msra.mxu1 %v468_v27  ;;  %v758_v21 = vld [vmem:[#allocation5 + $0x18] sm:$0xff] }
  0x4d   : > { %1088 = vmatprep.subr.mxu0 %v441_v23  ;;  %1059 = vmatprep.subr.mxu1 %v467_v29 }
  0x4e   : > { %1089 = vmatpush3.msra.mxu0 %v441_v23  ;;  %1060 = vmatpush3.msra.mxu1 %v467_v29  ;;  %v756_v23 = vld [vmem:[#allocation5 + $0x8] sm:$0xff] }
  0x4f   : > { %1090 = vmatprep.subr.mxu0 %v440_v25  ;;  %1061 = vmatprep.subr.mxu1 %v466_v31 }
  0x50   : > { %1091 = vmatpush3.msra.mxu0 %v440_v25  ;;  %1062 = vmatpush3.msra.mxu1 %v466_v31  ;;  %v949_v31 = vld [vmem:[%s1586_s4] ss:$0 sm:$0xff] }
  0x51   : > { %1092 = vmatprep.subr.mxu0 %v439_v26  ;;  %1063 = vmatprep.subr.mxu1 %v465_v33 }
  0x52   : > { %1093 = vmatpush3.msra.mxu0 %v439_v26  ;;  %1064 = vmatpush3.msra.mxu1 %v465_v33 }
  0x53   : > { %1094 = vmatprep.subr.mxu0 %v438_v28  ;;  %1065 = vmatprep.subr.mxu1 %v464_v35 }
  0x54   : > { %1095 = vmatpush3.msra.mxu0 %v438_v28  ;;  %1066 = vmatpush3.msra.mxu1 %v464_v35 }
  0x55   : > { %1096 = vmatprep.subr.mxu0 %v437_v30  ;;  %1105 = vmatprep.subr.mxu1 %v659_v36 }
  0x56   : > { %1097 = vmatpush3.msra.mxu0 %v437_v30 }
  0x57   : > { %1098 = vmatprep.subr.mxu0 %v436_v32 }
  0x58   : > { %1099 = vmatpush3.msra.mxu0 %v436_v32 }
  0x59   : > { %1100 = vmatprep.subr.mxu0 %v435_v34 }
  0x5a   : > { %1101 = vmatpush3.msra.mxu0 %v435_v34 }
  0x5b   : > { %1140 = vmatprep.subr.mxu0 %v1365_v9 }
  0xfb   : > { %v1034_v40 = vpop.f32.mrf.mxu0 }
  0xfc   : > { %v402_v41 = vadd.f32 %v1034_v40, %v943_v38 }
  0xfd   : > { %v396_v42 = vpop.f32.mrf.mxu0 }
  0xfe   : > { %v1514_v43 = vmax.f32 %v402_v41, 0.0  ;;  %v397_v44 = vadd.f32 %v943_v38, %v396_v42 }
 0x100   : > { %v1517_v46 = vmax.f32 %v397_v44, 0.0  ;;  %v452_v49 = vrot.slane %v1514_v43, 7  ;;  %v631_v50 = vrot.slane %v1514_v43, 1 }
 0x102   : > { %v630_v47 = vrot.slane %v1517_v46, 1  ;;  %1102 = vmatprep.mubr.f32.mxu0 %v1517_v46  ;;  %v451_v48 = vrot.slane %v1517_v46, 7 }
 0x103   : > { %1103 = vmatmul.mubr.f32.vlgmr.msra.gmra.mxu0 %v1514_v43 }
 0x104   : > { %v455_v51 = vsel %vm453_vm2, %v452_v49, %v451_v48  ;;  %v454_v52 = vsel %vm453_vm2, %v451_v48, %v452_v49  ;;  %v633_v54 = vsel %vm632_vm4, %v630_v47, %v631_v50  ;;  %v634_v7 = vsel %vm632_vm4, %v631_v50, %v630_v47  ;;  %1141 = vmatpush3.msra.mxu0 %v770_v8  ;;  %v771_v47 = vld [vmem:[%s1588_s6] sm:$0x1] }
 0x105   : > { %1067 = vmatprep.mubr.msk.f32.mxu1 %vm456_vm3, %v455_v51  ;;  %1142 = vmatprep.subr.mxu0 %v1365_v9 }
 0x106   : > { %1068 = vmatmul.mubr.f32.vlgmr.msra.gmra.mxu1 %v454_v52  ;;  %1143 = vmatpush3.msra.mxu0 %v769_v10 }
 0x107   : > { %1106 = vmatpush3.msra.mxu1 %v659_v36  ;;  %1137 = vmatprep.mubr.f32.mxu1 %v633_v54 }
 0x108   : > { %1107 = vmatprep.subr.mxu1 %v658_v53  ;;  %1144 = vmatprep.subr.mxu0 %v1365_v9 }
 0x109   : > { %1108 = vmatpush3.msra.mxu1 %v658_v53  ;;  %1145 = vmatpush3.msra.mxu0 %v768_v11 }
 0x10a   : > { %1109 = vmatprep.subr.mxu1 %v657_v55  ;;  %1146 = vmatprep.subr.mxu0 %v1365_v9 }
 0x10b   : > { %1110 = vmatpush3.msra.mxu1 %v657_v55  ;;  %1147 = vmatpush3.msra.mxu0 %v767_v12 }
 0x10c   : > { %1111 = vmatprep.subr.mxu1 %v656_v56  ;;  %1148 = vmatprep.subr.mxu0 %v1365_v9 }
 0x10d   : > { %1112 = vmatpush3.msra.mxu1 %v656_v56  ;;  %1149 = vmatpush3.msra.mxu0 %v766_v13 }
 0x10e   : > { %1113 = vmatprep.subr.mxu1 %v655_v57  ;;  %1150 = vmatprep.subr.mxu0 %v1365_v9 }
 0x10f   : > { %1114 = vmatpush3.msra.mxu1 %v655_v57  ;;  %1151 = vmatpush3.msra.mxu0 %v765_v14 }
 0x110   : > { %1115 = vmatprep.subr.mxu1 %v654_v58  ;;  %1152 = vmatprep.subr.mxu0 %v1365_v9 }
 0x111   : > { %1116 = vmatpush3.msra.mxu1 %v654_v58  ;;  %1153 = vmatpush3.msra.mxu0 %v764_v15 }
 0x112   : > { %1117 = vmatprep.subr.mxu1 %v653_v59  ;;  %1154 = vmatprep.subr.mxu0 %v1365_v9 }
 0x113   : > { %1118 = vmatpush3.msra.mxu1 %v653_v59  ;;  %1155 = vmatpush3.msra.mxu0 %v763_v16 }
 0x114   : > { %1119 = vmatprep.subr.mxu1 %v652_v60  ;;  %1156 = vmatprep.subr.mxu0 %v1365_v9 }
 0x115   : > { %1120 = vmatpush3.msra.mxu1 %v652_v60  ;;  %1157 = vmatpush3.msra.mxu0 %v762_v17 }
 0x116   : > { %1121 = vmatprep.subr.mxu1 %v651_v61  ;;  %1158 = vmatprep.subr.mxu0 %v1365_v9 }
 0x117   : > { %1122 = vmatpush3.msra.mxu1 %v651_v61  ;;  %1159 = vmatpush3.msra.mxu0 %v761_v18 }
 0x118   : > { %1123 = vmatprep.subr.mxu1 %v650_v62  ;;  %1160 = vmatprep.subr.mxu0 %v1365_v9 }
 0x119   : > { %1124 = vmatpush3.msra.mxu1 %v650_v62  ;;  %1161 = vmatpush3.msra.mxu0 %v760_v19 }
 0x11a   : > { %1125 = vmatprep.subr.mxu1 %v649_v63  ;;  %1162 = vmatprep.subr.mxu0 %v1365_v9 }
 0x11b   : > { %1126 = vmatpush3.msra.mxu1 %v649_v63  ;;  %1163 = vmatpush3.msra.mxu0 %v759_v20 }
 0x11c   : > { %1127 = vmatprep.subr.mxu1 %v648_v0  ;;  %1164 = vmatprep.subr.mxu0 %v1365_v9 }
 0x11d   : > { %1128 = vmatpush3.msra.mxu1 %v648_v0  ;;  %1165 = vmatpush3.msra.mxu0 %v758_v21 }
 0x11e   : > { %1129 = vmatprep.subr.mxu1 %v647_v1  ;;  %1166 = vmatprep.subr.mxu0 %v1365_v9 }
 0x11f   : > { %1130 = vmatpush3.msra.mxu1 %v647_v1  ;;  %1167 = vmatpush3.msra.mxu0 %v757_v22 }
 0x120   : > { %1131 = vmatprep.subr.mxu1 %v646_v3  ;;  %1172 = vmatprep.mubr.msk.f32.mxu0 %vm1366_vm6, %v1365_v9 }
 0x121   : > { %1132 = vmatpush3.msra.mxu1 %v646_v3  ;;  %1168 = vmatprep.subr.mxu0 %v1365_v9 }
 0x122   : > { %1133 = vmatprep.subr.mxu1 %v645_v4  ;;  %1169 = vmatpush3.msra.mxu0 %v756_v23 }
 0x123   : > { %1134 = vmatpush3.msra.mxu1 %v645_v4  ;;  %1170 = vmatprep.subr.mxu0 %v1365_v9 }
 0x124   : > { %1135 = vmatprep.subr.mxu1 %v644_v6  ;;  %1171 = vmatpush3.msra.mxu0 %v755_v24 }
 0x125   : > { %1136 = vmatpush3.msra.mxu1 %v644_v6 }
 0x126   : > { %1138 = vmatmul.mubr.msk.f32.vlgmr.msra.gmra.mxu1 %vm636_vm5, %v634_v7 }
 0x1c3   : > { %v1104_v26 = vpop.f32.mrf.mxu0 }
 0x1c5   : > { %v621_v29 = vpop.f32.mrf.mxu0 }
 0x1c6   : > { %v1069_v25 = vpop.f32.mrf.mxu1 }
 0x1c7   : > { %v627_v28 = vadd.f32 %v1104_v26, %v1069_v25 }
 0x1c8   : > { %v546_v27 = vpop.f32.mrf.mxu1 }
 0x1c9   : > { %v622_v32 = vadd.f32 %v621_v29, %v546_v27 }
 0x1e6   : > { %v1139_v30 = vpop.f32.mrf.mxu1 }
 0x1e7   : > { %v736_v33 = vadd.f32 %v1139_v30, %v627_v28 }
 0x1e8   : > { %v726_v34 = vpop.f32.mrf.mxu1 }
 0x1e9   : > { %v745_v35 = vadd.f32 %v949_v31, %v736_v33  ;;  %v735_v36 = vadd.f32 %v726_v34, %v622_v32 }
 0x1eb   : > { %v744_v37 = vadd.f32 %v949_v31, %v735_v36  ;;  %v747_v38 = vmax.f32 %v745_v35, 0.0 }
 0x1ed   : > { %v746_v39 = vmax.f32 %v744_v37, 0.0 }
 0x1ef   : > { %v748_v40 = vadd.f32 %v747_v38, %v746_v39 }
 0x1f1   : > { %v749_v41 = vrot.slane %v748_v40, 4 }
 0x1f3   : > { %v750_v42 = vadd.f32 %v749_v41, %v748_v40 }
 0x1f5   : > { %v751_v43 = vrot.slane %v750_v42, 2 }
 0x1f7   : > { %v752_v44 = vadd.f32 %v751_v43, %v750_v42 }
 0x1f9   : > { %v753_v45 = vrot.slane %v752_v44, 1 }
 0x1fb   : > { %v754_v46 = vadd.f32 %v753_v45, %v752_v44 }
 0x1fd   : > { %1173 = vmatmul.mubr.f32.vlgmr.msra.gmra.mxu0 %v754_v46 }
 0x2bd   : > { %v838_v48 = vpop.f32.mrf.mxu0 }
 0x2be   : > { %v839_v49 = vadd.f32 %v838_v48, %v771_v47 }
 0x2bf   : > { %v1174_v50 = vpop.f32.mrf.mxu0 }
 0x2c0   : > { %842 = vst [vmem:[%s301_s16] sm:$0x1] %v839_v49 }
 0x2c1   : > { %1304 = shalt.err (!%p1301_p3)
}
 0x2c2   : > { %s1305_s8 = scalar_lea.hbm %s1547_s20, 16  ;;  %s1309_s15 = scalar_lea.hbm %s1589_s7, 32 }
 0x2c3   : > { %p1306_p2 = scmp.ne.s32.totalorder %s1547_s20, %s1305_s8  ;;  %p1310_p7 = scmp.lt.s32.totalorder %s1547_s20, %s1589_s7 }
 0x2c4   : > { %p1311_p6 = scmp.lt.s32.totalorder %s1309_s15, %s1305_s8 }
 0x2c5   : > { %p1307_p4 = pnand %p1306_p2, %p1446_p5 }
 0x2c6   : > { %p1312_p9 = por %p1311_p6, %p1310_p7 }
 0x2c7   : > { %p1308_p13 = pneg %p1307_p4 }
 0x2c9   : > { %p1313_p10 = pnand %p1312_p9, %p1308_p13 }
 0x2cb   : > { %1316 = shalt.err (!%p1313_p10)
}
 0x2cc   : > { %1183 = dma.vmem_to_hbm [thread:$0]  (%p1446_p5), %s857_s17, 16, %s1547_s20, %s844_s21  }
 0x2cd PF: > { %p1200_p12 = scmp.ge.s32.totalorder %s1359_s27, 2  ;;  %s868_s18 = sand.u32 1, %s1347_s24  }
 0x2ce   : > { %p1599_p8 = scmp.ne.s32.totalorder %s1592_s12, 0  ;;  %s869_s19 = scalar_lea.sflag [#allocation4], %s868_s18 }
 0x2d0   : > { %p1193_p11 = pnand %p1200_p12, %p1599_p8 }
 0x2d2   : > { %p1194_p0 = pneg %p1193_p11 }
 0x2d4   : > { %1342 = dma.done.wait (%p1194_p0), %s869_s19, 16  }
 0x2d5   : > { %1344 = vsyncadd (%p1194_p0), %s869_s19, 4294967280  ;;  %p19_p1 = scmp.ge.s32.totalorder %s1433_s30, 4   ;;  %s1600_s24 = smov %s1351_s25 }
 0x2d6   : > { %s1601_s25 = smov %s1355_s26  ;;  %s1602_s26 = smov %s1444_s10 }
 0x2d7   : > { %s1603_s27 = smov %s1433_s30  ;;  %21 = sbr.rel (!%p19_p1) target bundleno = 5 (0x5), region = 94 }
 0x2dc   :  { %873 = vsyncpa [#allocation3], 1 }
 0x2dd   :  { %875 = vsyncpa [#allocation3 + $0x1], 1 }
 0x2de   :  { %876 = vsyncpa [#allocation6], 1 }
 0x2df   :  { %877 = vsyncpa [#allocation4], 1 }
 0x2e0   :  { %879 = vsyncpa [#allocation4 + $0x1], 1 }

</bundles_post_ra>
